<compile_context>
chip_gen: v5e
topology: v5e:2x2
jax: 0.10.0
libtpu: 0.0.40
codegen_flags: <defaults>
</compile_context>

<pallas_src>
import math
import functools

import jax
import jax.numpy as jnp
from jax import lax
from jax.experimental import pallas as pl
from jax.experimental.pallas import tpu as pltpu


_COMPUTE_DTYPE = jnp.bfloat16   # MXU input dtype for all matmuls
_NEG_BIG = -1e30                # finite "-inf" (avoids inf/NaN arithmetic paths)


def _st_flash_kernel(qp_ref, kp_ref, vp_ref, wo_ref, bo_ref, o_ref,
                     m_sc, l_sc, acc_sc, out_sc, *, tk, lk_valid, mask_keys):
    """Grid = (B, q_tiles, H, k_tiles); the two inner axes are sequential.

    qp_ref : (tq, dk) bf16   -- projected query tile, pre-scaled by 1/sqrt(dk)
    kp_ref : (tk, dk) bf16   -- projected key tile
    vp_ref : (tk, dv) bf16   -- projected value tile
    wo_ref : (dv, d_model) bf16 -- this head's slab of the output projection
    bo_ref : (1, d_model) f32
    o_ref  : (tq, d_model)   -- resident across the (H, k_tiles) axes
    m_sc / l_sc : (tq, 1) f32   -- online-softmax running max / sum (per head)
    acc_sc      : (tq, dv) f32  -- unnormalized per-head attention output
    out_sc      : (tq, d_model) f32 -- output-projection accumulator (across heads)
    """
    ih = pl.program_id(2)
    ik = pl.program_id(3)
    nh = pl.num_programs(2)
    nk = pl.num_programs(3)

    @pl.when((ih == 0) & (ik == 0))
    def _zero_output_acc():
        out_sc[...] = jnp.zeros_like(out_sc)

    @pl.when(ik == 0)
    def _init_head():
        m_sc[...] = jnp.full_like(m_sc, _NEG_BIG)
        l_sc[...] = jnp.zeros_like(l_sc)
        acc_sc[...] = jnp.zeros_like(acc_sc)

    q = qp_ref[...]          # (tq, dk) bf16, already scaled
    k = kp_ref[...]          # (tk, dk) bf16
    v = vp_ref[...]          # (tk, dv) bf16

    # s = q @ k^T  (contract last dims; bf16 MXU inputs, f32 accumulation)
    s = lax.dot_general(q, k, (((1,), (1,)), ((), ())),
                        preferred_element_type=jnp.float32)        # (tq, tk) f32

    if mask_keys:
        # Only emitted when Lk was padded: mask padded key columns.
        col = ik * tk + lax.broadcasted_iota(jnp.int32, s.shape, 1)
        s = jnp.where(col < lk_valid, s, _NEG_BIG)

    m_prev = m_sc[...]
    m_new = jnp.maximum(m_prev, jnp.max(s, axis=-1, keepdims=True))
    alpha = jnp.exp(m_prev - m_new)                                 # f32 (v5e-safe)
    p = jnp.exp(s - m_new)                                          # (tq, tk) f32

    l_sc[...] = alpha * l_sc[...] + jnp.sum(p, axis=-1, keepdims=True)
    acc_sc[...] = alpha * acc_sc[...] + jnp.dot(p.astype(v.dtype), v,
                                                preferred_element_type=jnp.float32)
    m_sc[...] = m_new

    @pl.when(ik == nk - 1)
    def _head_done():
        # Normalize this head and fold it through its wo slab into the shared
        # (tq, d_model) accumulator (VMEM scratch — nothing lives in registers).
        inv_l = pl.reciprocal(l_sc[...], approx=True)               # EUP slot
        head_o = (acc_sc[...] * inv_l).astype(wo_ref.dtype)         # (tq, dv) bf16
        out_sc[...] += jnp.dot(head_o, wo_ref[...],
                               preferred_element_type=jnp.float32)

    @pl.when((ih == nh - 1) & (ik == nk - 1))
    def _finalize():
        o_ref[...] = (out_sc[...] + bo_ref[...]).astype(o_ref.dtype)


def _round_up(x, m):
    return ((x + m - 1) // m) * m


def st_attention_layer(queries, keys, values, params, n_heads,
                       attn_mask=None, query_lengths=None, key_lengths=None,
                       support=None, max_q_tile=256, max_k_tile=1024):
    """JAX wrapper reproducing STAttentionLayer.forward()."""
    # TODO(synk): attn_mask / query_lengths / key_lengths masking not applied.
    del attn_mask, query_lengths, key_lengths, support

    B, L, N1, d_model = queries.shape
    _, S, N2, _ = keys.shape
    Lq, Lk = L * N1, S * N2
    H = n_heads

    wq, bq = params["wq"], params["bq"]
    wk, bk = params["wk"], params["bk"]
    wv, bv = params["wv"], params["bv"]
    wo, bo = params["wo"], params["bo"]
    dk = wq.shape[-1] // H
    dv = wv.shape[-1] // H
    scale = 1.0 / math.sqrt(dk)
    cdt = _COMPUTE_DTYPE

    # ---- Q/K/V projections: single wide bf16 matmuls, computed exactly once ----
    q2 = queries.reshape(B, Lq, d_model).astype(cdt)
    k2 = keys.reshape(B, Lk, d_model).astype(cdt)
    v2 = values.reshape(B, Lk, d_model).astype(cdt)

    # 1/sqrt(dk) folded into the Q projection weights (zero in-kernel cost).
    qp = jnp.dot(q2, (wq * scale).astype(cdt),
                 preferred_element_type=jnp.float32) + bq * scale
    kp = jnp.dot(k2, wk.astype(cdt), preferred_element_type=jnp.float32) + bk
    vp = jnp.dot(v2, wv.astype(cdt), preferred_element_type=jnp.float32) + bv

    # Head-major layout: per-head kernel blocks never split a vreg lane boundary.
    qp = qp.reshape(B, Lq, H, dk).transpose(0, 2, 1, 3).astype(cdt)   # (B,H,Lq,dk)
    kp = kp.reshape(B, Lk, H, dk).transpose(0, 2, 1, 3).astype(cdt)   # (B,H,Lk,dk)
    vp = vp.reshape(B, Lk, H, dv).transpose(0, 2, 1, 3).astype(cdt)   # (B,H,Lk,dv)

    # ---- tile selection: tq % 16 == 0, tk % 128 == 0; pad rather than one big tile
    max_q_tile = max(16, _round_up(max_q_tile, 16))
    max_k_tile = max(128, _round_up(max_k_tile, 128))
    tq = min(max_q_tile, _round_up(Lq, 16))
    tk = min(max_k_tile, _round_up(Lk, 128))
    Lq_pad = _round_up(Lq, tq)
    Lk_pad = _round_up(Lk, tk)
    nq, nk = Lq_pad // tq, Lk_pad // tk
    mask_keys = Lk_pad != Lk

    if Lq_pad != Lq:
        qp = jnp.pad(qp, ((0, 0), (0, 0), (0, Lq_pad - Lq), (0, 0)))
    if mask_keys:
        kp = jnp.pad(kp, ((0, 0), (0, 0), (0, Lk_pad - Lk), (0, 0)))
        vp = jnp.pad(vp, ((0, 0), (0, 0), (0, Lk_pad - Lk), (0, 0)))

    wo3 = wo.reshape(H, dv, d_model).astype(cdt)        # per-head wo slabs (bf16)
    bo2 = bo.reshape(1, d_model).astype(jnp.float32)

    kernel = functools.partial(_st_flash_kernel,
                               tk=tk, lk_valid=Lk, mask_keys=mask_keys)

    out = pl.pallas_call(
        kernel,
        out_shape=jax.ShapeDtypeStruct((B, Lq_pad, d_model), queries.dtype),
        grid_spec=pltpu.PrefetchScalarGridSpec(
            num_scalar_prefetch=0,
            grid=(B, nq, H, nk),
            in_specs=[
                # projected query / key / value tiles (batch & head dims squeezed)
                pl.BlockSpec((None, None, tq, dk), lambda b, iq, ih, ik: (b, ih, iq, 0)),
                pl.BlockSpec((None, None, tk, dk), lambda b, iq, ih, ik: (b, ih, ik, 0)),
                pl.BlockSpec((None, None, tk, dv), lambda b, iq, ih, ik: (b, ih, ik, 0)),
                # this head's output-projection slab + bias
                pl.BlockSpec((None, dv, d_model), lambda b, iq, ih, ik: (ih, 0, 0)),
                pl.BlockSpec((1, d_model), lambda b, iq, ih, ik: (0, 0)),
            ],
            # output block resident across the (head, k-tile) reduction axes
            out_specs=pl.BlockSpec((None, tq, d_model), lambda b, iq, ih, ik: (b, iq, 0)),
            scratch_shapes=[
                pltpu.VMEM((tq, 1), jnp.float32),        # m (running max)
                pltpu.VMEM((tq, 1), jnp.float32),        # l (running sum)
                pltpu.VMEM((tq, dv), jnp.float32),       # per-head unnormalized acc
                pltpu.VMEM((tq, d_model), jnp.float32),  # output-projection acc
            ],
        ),
        compiler_params=pltpu.CompilerParams(
            # (B, q_tiles) shard across megacore; keep B*nq >= 2 on v7x.
            dimension_semantics=("parallel", "parallel", "arbitrary", "arbitrary"),
            # Footprint is small (projection weights live outside the kernel);
            # 64 MiB is safe on v7x and leaves plenty of slack on v5e/v6e.
            vmem_limit_bytes=64 * 1024 * 1024,
        ),
    )(qp, kp, vp, wo3, bo2)

    out = out[:, :Lq, :]
    return out.reshape(B, L, N1, d_model)


def _reference(queries, keys, values, params, n_heads):
    """Pure-JAX f32 reference of the same math (sanity check)."""
    B, L, N1, d_model = queries.shape
    _, S, N2, _ = keys.shape
    Lq, Lk = L * N1, S * N2
    H = n_heads
    dk = params["wq"].shape[-1] // H
    dv = params["wv"].shape[-1] // H

    q = queries.reshape(B, Lq, d_model)
    k = keys.reshape(B, Lk, d_model)
    v = values.reshape(B, Lk, d_model)

    Q = (q @ params["wq"] + params["bq"]).reshape(B, Lq, H, dk)
    K = (k @ params["wk"] + params["bk"]).reshape(B, Lk, H, dk)
    V = (v @ params["wv"] + params["bv"]).reshape(B, Lk, H, dv)

    s = jnp.einsum("blhe,bshe->bhls", Q, K) / math.sqrt(dk)
    p = jax.nn.softmax(s, axis=-1)
    o = jnp.einsum("bhls,bshd->blhd", p, V).reshape(B, Lq, H * dv)
    o = o @ params["wo"] + params["bo"]
    return o.reshape(B, L, N1, d_model)


def _init_params(key, d_model, n_heads, d_keys, d_values):
    ks = jax.random.split(key, 8)
    s = 1.0 / math.sqrt(d_model)
    return {
        "wq": jax.random.uniform(ks[0], (d_model, n_heads * d_keys), jnp.float32, -s, s),
        "bq": jax.random.uniform(ks[1], (1, n_heads * d_keys), jnp.float32, -s, s),
        "wk": jax.random.uniform(ks[2], (d_model, n_heads * d_keys), jnp.float32, -s, s),
        "bk": jax.random.uniform(ks[3], (1, n_heads * d_keys), jnp.float32, -s, s),
        "wv": jax.random.uniform(ks[4], (d_model, n_heads * d_values), jnp.float32, -s, s),
        "bv": jax.random.uniform(ks[5], (1, n_heads * d_values), jnp.float32, -s, s),
        "wo": jax.random.uniform(ks[6], (n_heads * d_values, d_model), jnp.float32, -s, s),
        "bo": jax.random.uniform(ks[7], (1, d_model), jnp.float32, -s, s),
    }


if __name__ == "__main__":
    B, L, N1, S, N2 = 2, 4, 4, 4, 4
    d_model, n_heads = 32, 4
    d_keys = d_model // n_heads
    d_values = d_model // n_heads

    key = jax.random.PRNGKey(0)
    kq, kk, kv, kp = jax.random.split(key, 4)
    queries = jax.random.normal(kq, (B, L, N1, d_model), jnp.float32)
    keys = jax.random.normal(kk, (B, S, N2, d_model), jnp.float32)
    values = jax.random.normal(kv, (B, S, N2, d_model), jnp.float32)
    params = _init_params(kp, d_model, n_heads, d_keys, d_values)

    out = st_attention_layer(queries, keys, values, params, n_heads)
    out = jax.block_until_ready(out)

    ref = _reference(queries, keys, values, params, n_heads)
    assert out.shape == (B, L, N1, d_model)
    # Tolerance accounts for bf16 MXU inputs (f32 accumulation) + approx reciprocal.
    assert jnp.allclose(out, ref, rtol=2e-2, atol=2e-2), "mismatch vs reference"

    print("KERNEL_OK")
</pallas_src>

<mosaic_0001>
module attributes {stable_mosaic.version = 11 : i64} {
  func.func @_st_flash_kernel(%arg0: i32, %arg1: i32, %arg2: i32, %arg3: i32, %arg4: memref<1x1x16x8xbf16, #tpu.memory_space<vmem>>, %arg5: memref<1x1x128x8xbf16, #tpu.memory_space<vmem>>, %arg6: memref<1x1x128x8xbf16, #tpu.memory_space<vmem>>, %arg7: memref<1x8x32xbf16, #tpu.memory_space<vmem>>, %arg8: memref<1x32xf32, #tpu.memory_space<vmem>>, %arg9: memref<1x16x32xf32, #tpu.memory_space<vmem>>, %arg10: memref<16x1xf32, #tpu.memory_space<vmem>>, %arg11: memref<16x1xf32, #tpu.memory_space<vmem>>, %arg12: memref<16x8xf32, #tpu.memory_space<vmem>>, %arg13: memref<16x32xf32, #tpu.memory_space<vmem>>) attributes {dimension_semantics = [#tpu.dimension_semantics<parallel>, #tpu.dimension_semantics<parallel>, #tpu.dimension_semantics<arbitrary>, #tpu.dimension_semantics<arbitrary>], iteration_bounds = array<i64: 2, 1, 4, 1>, scalar_prefetch = 0 : i64, scratch_operands = 4 : i64, tpu.core_type = #tpu.core_type<tc>, window_params = [{transform_indices = @transform_0, window_bounds = array<i64: 1, 1, 16, 8>}, {transform_indices = @transform_1, window_bounds = array<i64: 1, 1, 128, 8>}, {transform_indices = @transform_2, window_bounds = array<i64: 1, 1, 128, 8>}, {transform_indices = @transform_3, window_bounds = array<i64: 1, 8, 32>}, {pipeline_mode = #tpu.pipeline_mode<synchronous>, transform_indices = @transform_4, window_bounds = array<i64: 1, 32>}, {transform_indices = @transform_5, window_bounds = array<i64: 1, 16, 32>}]} {
    %c0_i32 = arith.constant 0 : i32
    %0 = arith.cmpi eq, %arg2, %c0_i32 : i32
    %c0_i32_0 = arith.constant 0 : i32
    %1 = arith.cmpi eq, %arg3, %c0_i32_0 : i32
    %2 = arith.andi %0, %1 : i1
    %3 = arith.extui %2 : i1 to i32
    %c0_i32_1 = arith.constant 0 : i32
    %4 = arith.cmpi ne, %3, %c0_i32_1 : i32
    scf.if %4 {
      %cst_35 = arith.constant 0.000000e+00 : f32
      %54 = vector.broadcast %cst_35 : f32 to vector<16x32xf32>
      %c0_36 = arith.constant 0 : index
      %c0_37 = arith.constant 0 : index
      %55 = vector.load %arg13[%c0_36, %c0_37] : memref<16x32xf32, #tpu.memory_space<vmem>>, vector<16x32xf32>
      tpu.vector_store %arg13[%c0_36, %c0_37], %54 {strides = array<i32>} : memref<16x32xf32, #tpu.memory_space<vmem>>, vector<16x32xf32>,
    } else {
    }
    %c0_i32_2 = arith.constant 0 : i32
    %5 = arith.cmpi eq, %arg3, %c0_i32_2 : i32
    %6 = arith.extui %5 : i1 to i32
    %c0_i32_3 = arith.constant 0 : i32
    %7 = arith.cmpi ne, %6, %c0_i32_3 : i32
    scf.if %7 {
      %cst_35 = arith.constant -1.000000e+30 : f32
      %54 = vector.broadcast %cst_35 : f32 to vector<16x1xf32>
      %c0_36 = arith.constant 0 : index
      %c0_37 = arith.constant 0 : index
      %55 = vector.load %arg10[%c0_36, %c0_37] : memref<16x1xf32, #tpu.memory_space<vmem>>, vector<16x1xf32>
      tpu.vector_store %arg10[%c0_36, %c0_37], %54 {strides = array<i32>} : memref<16x1xf32, #tpu.memory_space<vmem>>, vector<16x1xf32>,
      %cst_38 = arith.constant 0.000000e+00 : f32
      %56 = vector.broadcast %cst_38 : f32 to vector<16x1xf32>
      %c0_39 = arith.constant 0 : index
      %c0_40 = arith.constant 0 : index
      %57 = vector.load %arg11[%c0_39, %c0_40] : memref<16x1xf32, #tpu.memory_space<vmem>>, vector<16x1xf32>
      tpu.vector_store %arg11[%c0_39, %c0_40], %56 {strides = array<i32>} : memref<16x1xf32, #tpu.memory_space<vmem>>, vector<16x1xf32>,
      %cst_41 = arith.constant 0.000000e+00 : f32
      %58 = vector.broadcast %cst_41 : f32 to vector<16x8xf32>
      %c0_42 = arith.constant 0 : index
      %c0_43 = arith.constant 0 : index
      %59 = vector.load %arg12[%c0_42, %c0_43] : memref<16x8xf32, #tpu.memory_space<vmem>>, vector<16x8xf32>
      tpu.vector_store %arg12[%c0_42, %c0_43], %58 {strides = array<i32>} : memref<16x8xf32, #tpu.memory_space<vmem>>, vector<16x8xf32>,
    } else {
    }
    %c0 = arith.constant 0 : index
    %c0_4 = arith.constant 0 : index
    %c0_5 = arith.constant 0 : index
    %c0_6 = arith.constant 0 : index
    %8 = vector.load %arg4[%c0, %c0_4, %c0_5, %c0_6] : memref<1x1x16x8xbf16, #tpu.memory_space<vmem>>, vector<1x1x16x8xbf16>
    %9 = vector.shape_cast %8 : vector<1x1x16x8xbf16> to vector<16x8xbf16>
    %c0_7 = arith.constant 0 : index
    %c0_8 = arith.constant 0 : index
    %c0_9 = arith.constant 0 : index
    %c0_10 = arith.constant 0 : index
    %10 = vector.load %arg5[%c0_7, %c0_8, %c0_9, %c0_10] : memref<1x1x128x8xbf16, #tpu.memory_space<vmem>>, vector<1x1x128x8xbf16>
    %11 = vector.shape_cast %10 : vector<1x1x128x8xbf16> to vector<128x8xbf16>
    %c0_11 = arith.constant 0 : index
    %c0_12 = arith.constant 0 : index
    %c0_13 = arith.constant 0 : index
    %c0_14 = arith.constant 0 : index
    %12 = vector.load %arg6[%c0_11, %c0_12, %c0_13, %c0_14] : memref<1x1x128x8xbf16, #tpu.memory_space<vmem>>, vector<1x1x128x8xbf16>
    %13 = vector.shape_cast %12 : vector<1x1x128x8xbf16> to vector<128x8xbf16>
    %cst = arith.constant dense<0.000000e+00> : vector<16x128xf32>
    %14 = tpu.matmul %9, %11, %cst {dimension_numbers = #tpu.dot_dimension_numbers<[1], [1], [0], [0], [0, 0, 1, 0], [], []>} : vector<16x8xbf16>, vector<128x8xbf16>, vector<16x128xf32> -> vector<16x128xf32>
    %c128_i32 = arith.constant 128 : i32
    %15 = arith.muli %arg3, %c128_i32 : i32
    %16 = tpu.iota {dimensions = array<i32: 1>} : vector<16x128xi32>
    %17 = vector.broadcast %15 : i32 to vector<16x128xi32>
    %18 = arith.addi %17, %16 : vector<16x128xi32>
    %c16_i32 = arith.constant 16 : i32
    %19 = vector.broadcast %c16_i32 : i32 to vector<16x128xi32>
    %20 = arith.cmpi slt, %18, %19 : vector<16x128xi32>
    %cst_15 = arith.constant -1.000000e+30 : f32
    %21 = vector.broadcast %cst_15 : f32 to vector<16x128xf32>
    %22 = arith.select %20, %14, %21 : vector<16x128xi1>, vector<16x128xf32>
    %c0_16 = arith.constant 0 : index
    %c0_17 = arith.constant 0 : index
    %23 = vector.load %arg10[%c0_16, %c0_17] : memref<16x1xf32, #tpu.memory_space<vmem>>, vector<16x1xf32>
    %cst_18 = arith.constant dense<0xFF800000> : vector<16xf32>
    %24 = vector.multi_reduction <maximumf>, %22, %cst_18 [1] : vector<16x128xf32> to vector<16xf32>
    %25 = vector.shape_cast %24 : vector<16xf32> to vector<16x1xf32>
    %26 = arith.maximumf %23, %25 : vector<16x1xf32>
    %27 = arith.subf %23, %26 : vector<16x1xf32>
    %28 = math.exp %27 : vector<16x1xf32>
    %29 = vector.broadcast %26 : vector<16x1xf32> to vector<16x128xf32>
    %30 = arith.subf %22, %29 : vector<16x128xf32>
    %31 = math.exp %30 : vector<16x128xf32>
    %c0_19 = arith.constant 0 : index
    %c0_20 = arith.constant 0 : index
    %32 = vector.load %arg11[%c0_19, %c0_20] : memref<16x1xf32, #tpu.memory_space<vmem>>, vector<16x1xf32>
    %33 = arith.mulf %28, %32 : vector<16x1xf32>
    %cst_21 = arith.constant dense<0.000000e+00> : vector<16xf32>
    %34 = vector.multi_reduction <add>, %31, %cst_21 [1] : vector<16x128xf32> to vector<16xf32>
    %35 = vector.shape_cast %34 : vector<16xf32> to vector<16x1xf32>
    %36 = arith.addf %33, %35 : vector<16x1xf32>
    %c0_22 = arith.constant 0 : index
    %c0_23 = arith.constant 0 : index
    %37 = vector.load %arg11[%c0_22, %c0_23] : memref<16x1xf32, #tpu.memory_space<vmem>>, vector<16x1xf32>
    tpu.vector_store %arg11[%c0_22, %c0_23], %36 {strides = array<i32>} : memref<16x1xf32, #tpu.memory_space<vmem>>, vector<16x1xf32>,
    %c0_24 = arith.constant 0 : index
    %c0_25 = arith.constant 0 : index
    %38 = vector.load %arg12[%c0_24, %c0_25] : memref<16x8xf32, #tpu.memory_space<vmem>>, vector<16x8xf32>
    %39 = vector.broadcast %28 : vector<16x1xf32> to vector<16x8xf32>
    %40 = arith.mulf %39, %38 : vector<16x8xf32>
    %41 = arith.truncf %31 : vector<16x128xf32> to vector<16x128xbf16>
    %cst_26 = arith.constant dense<0.000000e+00> : vector<16x8xf32>
    %42 = tpu.matmul %41, %13, %cst_26 {dimension_numbers = #tpu.dot_dimension_numbers<[1], [0], [0], [1], [0, 0, 1, 1], [], []>} : vector<16x128xbf16>, vector<128x8xbf16>, vector<16x8xf32> -> vector<16x8xf32>
    %43 = arith.addf %40, %42 : vector<16x8xf32>
    %c0_27 = arith.constant 0 : index
    %c0_28 = arith.constant 0 : index
    %44 = vector.load %arg12[%c0_27, %c0_28] : memref<16x8xf32, #tpu.memory_space<vmem>>, vector<16x8xf32>
    tpu.vector_store %arg12[%c0_27, %c0_28], %43 {strides = array<i32>} : memref<16x8xf32, #tpu.memory_space<vmem>>, vector<16x8xf32>,
    %c0_29 = arith.constant 0 : index
    %c0_30 = arith.constant 0 : index
    %45 = vector.load %arg10[%c0_29, %c0_30] : memref<16x1xf32, #tpu.memory_space<vmem>>, vector<16x1xf32>
    tpu.vector_store %arg10[%c0_29, %c0_30], %26 {strides = array<i32>} : memref<16x1xf32, #tpu.memory_space<vmem>>, vector<16x1xf32>,
    %c0_i32_31 = arith.constant 0 : i32
    %46 = arith.cmpi eq, %arg3, %c0_i32_31 : i32
    %47 = arith.extui %46 : i1 to i32
    %c0_i32_32 = arith.constant 0 : i32
    %48 = arith.cmpi ne, %47, %c0_i32_32 : i32
    scf.if %48 {
      %c0_35 = arith.constant 0 : index
      %c0_36 = arith.constant 0 : index
      %54 = vector.load %arg11[%c0_35, %c0_36] : memref<16x1xf32, #tpu.memory_space<vmem>>, vector<16x1xf32>
      %55 = tpu.reciprocal %54 {approx = true} : vector<16x1xf32> -> vector<16x1xf32>
      %c0_37 = arith.constant 0 : index
      %c0_38 = arith.constant 0 : index
      %56 = vector.load %arg12[%c0_37, %c0_38] : memref<16x8xf32, #tpu.memory_space<vmem>>, vector<16x8xf32>
      %57 = vector.broadcast %55 : vector<16x1xf32> to vector<16x8xf32>
      %58 = arith.mulf %56, %57 : vector<16x8xf32>
      %59 = arith.truncf %58 : vector<16x8xf32> to vector<16x8xbf16>
      %c0_39 = arith.constant 0 : index
      %c0_40 = arith.constant 0 : index
      %60 = vector.load %arg13[%c0_39, %c0_40] : memref<16x32xf32, #tpu.memory_space<vmem>>, vector<16x32xf32>
      %c0_41 = arith.constant 0 : index
      %c0_42 = arith.constant 0 : index
      %c0_43 = arith.constant 0 : index
      %61 = vector.load %arg7[%c0_41, %c0_42, %c0_43] : memref<1x8x32xbf16, #tpu.memory_space<vmem>>, vector<1x8x32xbf16>
      %62 = vector.shape_cast %61 : vector<1x8x32xbf16> to vector<8x32xbf16>
      %cst_44 = arith.constant dense<0.000000e+00> : vector<16x32xf32>
      %63 = tpu.matmul %59, %62, %cst_44 {dimension_numbers = #tpu.dot_dimension_numbers<[1], [0], [0], [1], [0, 0, 1, 1], [], []>} : vector<16x8xbf16>, vector<8x32xbf16>, vector<16x32xf32> -> vector<16x32xf32>
      %64 = arith.addf %60, %63 : vector<16x32xf32>
      %c0_45 = arith.constant 0 : index
      %c0_46 = arith.constant 0 : index
      %65 = vector.load %arg13[%c0_45, %c0_46] : memref<16x32xf32, #tpu.memory_space<vmem>>, vector<16x32xf32>
      tpu.vector_store %arg13[%c0_45, %c0_46], %64 {strides = array<i32>} : memref<16x32xf32, #tpu.memory_space<vmem>>, vector<16x32xf32>,
    } else {
    }
    %c3_i32 = arith.constant 3 : i32
    %49 = arith.cmpi eq, %arg2, %c3_i32 : i32
    %c0_i32_33 = arith.constant 0 : i32
    %50 = arith.cmpi eq, %arg3, %c0_i32_33 : i32
    %51 = arith.andi %49, %50 : i1
    %52 = arith.extui %51 : i1 to i32
    %c0_i32_34 = arith.constant 0 : i32
    %53 = arith.cmpi ne, %52, %c0_i32_34 : i32
    scf.if %53 {
      %c0_35 = arith.constant 0 : index
      %c0_36 = arith.constant 0 : index
      %54 = vector.load %arg13[%c0_35, %c0_36] : memref<16x32xf32, #tpu.memory_space<vmem>>, vector<16x32xf32>
      %c0_37 = arith.constant 0 : index
      %c0_38 = arith.constant 0 : index
      %55 = vector.load %arg8[%c0_37, %c0_38] : memref<1x32xf32, #tpu.memory_space<vmem>>, vector<1x32xf32>
      %56 = vector.broadcast %55 : vector<1x32xf32> to vector<16x32xf32>
      %57 = arith.addf %54, %56 : vector<16x32xf32>
      %c0_39 = arith.constant 0 : index
      %c0_40 = arith.constant 0 : index
      %c0_41 = arith.constant 0 : index
      %58 = vector.load %arg9[%c0_39, %c0_40, %c0_41] : memref<1x16x32xf32, #tpu.memory_space<vmem>>, vector<1x16x32xf32>
      %59 = vector.shape_cast %58 : vector<1x16x32xf32> to vector<16x32xf32>
      %60 = vector.shape_cast %57 : vector<16x32xf32> to vector<1x16x32xf32>
      tpu.vector_store %arg9[%c0_39, %c0_40, %c0_41], %60 {strides = array<i32>} : memref<1x16x32xf32, #tpu.memory_space<vmem>>, vector<1x16x32xf32>,
    } else {
    }
    return
  }
  func.func @transform_0(%arg0: i32, %arg1: i32, %arg2: i32, %arg3: i32) -> (i32, i32, i32, i32) {
    %c0_i32 = arith.constant 0 : i32
    %c0_i32_0 = arith.constant 0 : i32
    return %arg0, %arg2, %arg1, %c0_i32 : i32, i32, i32, i32
  }
  func.func @transform_1(%arg0: i32, %arg1: i32, %arg2: i32, %arg3: i32) -> (i32, i32, i32, i32) {
    %c0_i32 = arith.constant 0 : i32
    %c0_i32_0 = arith.constant 0 : i32
    return %arg0, %arg2, %arg3, %c0_i32 : i32, i32, i32, i32
  }
  func.func @transform_2(%arg0: i32, %arg1: i32, %arg2: i32, %arg3: i32) -> (i32, i32, i32, i32) {
    %c0_i32 = arith.constant 0 : i32
    %c0_i32_0 = arith.constant 0 : i32
    return %arg0, %arg2, %arg3, %c0_i32 : i32, i32, i32, i32
  }
  func.func @transform_3(%arg0: i32, %arg1: i32, %arg2: i32, %arg3: i32) -> (i32, i32, i32) {
    %c0_i32 = arith.constant 0 : i32
    %c0_i32_0 = arith.constant 0 : i32
    %c0_i32_1 = arith.constant 0 : i32
    return %arg2, %c0_i32, %c0_i32_0 : i32, i32, i32
  }
  func.func @transform_4(%arg0: i32, %arg1: i32, %arg2: i32, %arg3: i32) -> (i32, i32) {
    %c0_i32 = arith.constant 0 : i32
    %c0_i32_0 = arith.constant 0 : i32
    %c0_i32_1 = arith.constant 0 : i32
    return %c0_i32, %c0_i32_0 : i32, i32
  }
  func.func @transform_5(%arg0: i32, %arg1: i32, %arg2: i32, %arg3: i32) -> (i32, i32, i32) {
    %c0_i32 = arith.constant 0 : i32
    %c0_i32_0 = arith.constant 0 : i32
    return %arg0, %arg1, %c0_i32 : i32, i32, i32
  }
}

</mosaic_0001>

<bundles_post_ra>
// kernel: tpu_custom_call.1
= control target key start
LH: loop header
LB: loop body
LE: loop exit
PB: predicated region body
PF: predicated region fallthrough
CT: control target
= control target key end

     0   :  { %10 = vsyncpa [#allocation7], 0  ;;  %s1444_s0 = inlined_call_operand.vmem [shape: bf16[2,4,16,8], index: 0, kind: input, shape index: {}]   ;;  %s1445_s1 = inlined_call_operand.vmem [shape: bf16[2,4,128,8], index: 1, kind: input, shape index: {}]   ;;  %s1446_s2 = inlined_call_operand.vmem [shape: bf16[2,4,128,8], index: 2, kind: input, shape index: {}]   ;;  %s1447_s3 = inlined_call_operand.vmem [shape: bf16[4,8,32], index: 3, kind: input, shape index: {}]   ;;  %s1448_s4 = inlined_call_operand.vmem [shape: f32[1,32], index: 4, kind: input, shape index: {}]   ;;  %s1449_s5 = inlined_call_operand.hbm [shape: f32[2,16,32], index: 5, kind: output, shape index: {}]  }
   0x1   :  { %12 = vsyncpa [#allocation7 + $0x1], 0  ;;  %s1252_s18 = smov 0   ;;  %s1254_s19 = smov 0  }
   0x2   :  { %s1256_s20 = smov 0   ;;  %s1258_s21 = smov 0  }
   0x3   :  { %s1260_s22 = smov 0   ;;  %s1262_s23 = smov 0  }
   0x4   :  { %s1264_s24 = smov 0   ;;  %s1266_s25 = smov 0  }
   0x5 LB: > { %1457 = sst [smem:[#allocation9_spill]] %s1186_s18  ;;  %s914_s26 = sadd.s32 4294967295, %s1214_s25   ;;  %s1214_s25 = sphi %s1266_s25, %s18_s25   ;;  %s1210_s24 = sphi %s1264_s24, %s1475_s24   ;;  %s1206_s23 = sphi %s1262_s23, %s1474_s23   ;;  %s1202_s22 = sphi %s1260_s22, %s1473_s22   ;;  %s1198_s21 = sphi %s1258_s21, %s1479_s21   ;;  %s1194_s20 = sphi %s1256_s20, %s1478_s20   ;;  %s1190_s19 = sphi %s1254_s19, %s1477_s19   ;;  %s1186_s18 = sphi %s1252_s18, %s1476_s18  }
   0x6   : > { %1458 = sst [smem:[#allocation10_spill]] %s1194_s20  ;;  %s915_s27 = sadd.s32 4294967294, %s1214_s25  }
   0x7   : > { %1459 = sst [smem:[#allocation11_spill]] %s1206_s23  ;;  %s36_s28 = sadd.s32 1, %s1206_s23 }
   0x8   : > { %1460 = sst [smem:[#allocation12_spill]] %s1210_s24  ;;  %p38_p0 = scmp.ge.s32.totalorder %s36_s28, 4 }
   0x9   : > { %s44_s29 = sadd.s32 1, %s1210_s24  ;;  %p200_p1 = scmp.ne.s32.totalorder %s1194_s20, %s1190_s19 }
   0xa   : > { %p201_p2 = scmp.eq.s32.totalorder %s914_s26, 7  ;;  %s1481_s28 = smov (%p38_p0, %s36_s28), 0 }
   0xb   : > { %1461 = sst [smem:[#allocation13_spill]] %s1481_s28  ;;  %s1483_s29 = smov (!%p38_p0, %s44_s29), %s1210_s24 }
   0xc   : > { %p1301_p3 = por %p201_p2, %p200_p1  ;;  %p206_p4 = scmp.ne.s32.totalorder %s1190_s19, %s1186_s18 }
   0xd   : > { %p46_p5 = scmp.ge.s32.totalorder %s1483_s29, 2  ;;  %p207_p6 = scmp.eq.s32.totalorder %s915_s27, 7 }
   0xe   : > { %p918_p7 = scmp.ge.s32.totalorder %s1214_s25, 1  ;;  %p286_p8 = scmp.lt.s32.totalorder %s1214_s25, 9 }
   0xf   : > { %s1485_s29 = smov (%p46_p5, %s1483_s29), 0  ;;  %p1311_p9 = por %p207_p6, %p206_p4 }
  0x10   : > { %1463 = sst [smem:[#allocation14_spill]] %s1485_s29  ;;  %p287_p10 = pnand %p918_p7, %p286_p8 }
  0x11   : > { %s1464_s6 = scalar_select %p1311_p9, 1, 0 }
  0x12   : > { %s185_s7 = ssub.s32 %s1210_s24, %s1485_s29  ;;  %s190_s8 = sadd.s32 1, %s1194_s20 }
  0x13   : > { %1465 = sst [smem:[#allocation15_spill]] %s1464_s6  ;;  %p188_p11 = scmp.eq.s32.totalorder %s185_s7, 0 }
  0x14   : > { %290 = sbr.rel (%p287_p10) target bundleno = 904 (0x388), region = 40  ;;  %s1453_s10 = sand.u32 (!%p287_p10), 1, %s1190_s19  }
  0x15   : > { %s1319_s9 = scalar_select %p188_p11, %s1194_s20, %s190_s8  }
  0x16   : > { %p353_p12 = scmp.lt.s32.totalorder (!%p287_p10), %s1202_s22, 1  ;;  %s919_s11 = sshll.u32 (!%p287_p10), %s1453_s10, 4 }
  0x17   : > { %1466 = sst [smem:[#allocation16_spill]] %s1319_s9  ;;  %p355_p13 = scmp.lt.s32.totalorder (!%p287_p10), %s1198_s21, 3 }
  0x18   : > { %p400_p0 = scmp.eq.s32.totalorder (!%p287_p10), %s1198_s21, 0 }
  0x19   : > { %s354_s12 = scalar_select %p353_p12, %s1202_s22, 1  ;;  %vm406_vm0 = vcmask (%p400_p0), 261120   ;;  %v1216_v0 = vmov (%p400_p0), 0.0  }
  0x1a   : > { %s356_s13 = scalar_select %p355_p13, %s1198_s21, 3  ;;  %407 = vst.msk [vmem:[#allocation5] sm:$0xff] (%p400_p0), %vm406_vm0, %v1216_v0 }
  0x1b   : > { %s921_s14 = sshll.u32 %s354_s12, 3  ;;  %s924_s15 = sshll.u32 %s354_s12, 6  ;;  %408 = vst.msk [vmem:[#allocation5 + $0x8] sm:$0xff] (%p400_p0), %vm406_vm0, %v1216_v0 }
  0x1c   : > { %s920_s16 = sshll.u32 %s356_s13, 1  ;;  %s923_s17 = sshll.u32 %s356_s13, 4 }
  0x1d   : > { %s362_s26 = sadd.s32 %s921_s14, %s920_s16  ;;  %s376_s27 = sadd.s32 %s924_s15, %s923_s17 }
  0x1e   : > { %s922_s7 = sshll.u32 %s362_s26, 2  ;;  %s925_s8 = sshll.u32 %s376_s27, 2 }
  0x1f   : > { %s1332_s24 = scalar_lea.vmem %s1444_s0, %s922_s7  ;;  %s1337_s10 = scalar_lea.vmem %s1445_s1, %s925_s8 }
  0x20   : > { %s1342_s12 = scalar_lea.vmem %s1446_s2, %s925_s8  ;;  %s929_s18 = sshll.u32 %s356_s13, 2 }
  0x21   : > { %s1347_s16 = scalar_lea.vmem %s1447_s3, %s929_s18  ;;  %s1349_s17 = scalar_lea.vmem [#allocation6], %s919_s11 }
  0x22   : > { %405 = sbr.rel (!%p400_p0) target bundleno = 39 (0x27), region = 44 }
  0x27 PF: > { %vm417_vm1 = vcmask 64512   ;;  %v1016_v1 = vld [vmem:[%s1337_s10 + $0x38] sm:$0xff]  ;;  %v1015_v3 = vld [vmem:[%s1337_s10 + $0x30] sm:$0xff]  ;;  %v1014_v5 = vld [vmem:[%s1337_s10 + $0x28] sm:$0xff]  ;;  %v542_v18 = vlaneseq  ;;  %vm412_vm3 = vcmask 7168   ;;  %v1218_v25 = vmov 0  }
  0x28   : > { %v525_v2 = vsel %vm417_vm1, %v1016_v1, 0  ;;  %v522_v4 = vsel %vm417_vm1, %v1015_v3, 0  ;;  %v519_v6 = vsel %vm417_vm1, %v1014_v5, 0  ;;  %v1013_v7 = vld [vmem:[%s1337_s10 + $0x20] sm:$0xff]  ;;  %v1012_v9 = vld [vmem:[%s1337_s10 + $0x18] sm:$0xff]  ;;  %v1011_v11 = vld [vmem:[%s1337_s10 + $0x10] sm:$0xff]  ;;  %1104 = vset.pattern.permute.xlu1 %v1218_v25  ;;  %1105 = vset.pattern.permute.xlu0 %v1218_v25 }
  0x29   : > { %527 = vmatpush.bf16.xpose.msra.mxu0 %v525_v2  ;;  %v516_v8 = vsel %vm417_vm1, %v1013_v7, 0  ;;  %v513_v10 = vsel %vm417_vm1, %v1012_v9, 0  ;;  %v510_v12 = vsel %vm417_vm1, %v1011_v11, 0  ;;  %v1010_v13 = vld [vmem:[%s1337_s10 + $0x8] sm:$0xff]  ;;  %v1009_v15 = vld [vmem:[%s1337_s10] sm:$0xff]  ;;  %v543_v19 = vand.u32 127, %v542_v18  ;;  %1106 = vset.pattern.permute.xlu2 %v1218_v25 }
  0x2a   : > { %v507_v14 = vsel %vm417_vm1, %v1010_v13, 0  ;;  %v504_v16 = vsel %vm417_vm1, %v1009_v15, 0  ;;  %v1008_v17 = vld [vmem:[%s1332_s24] sm:$0xff]  ;;  %v1217_v24 = vmov -1e+30   ;;  %v1219_v26 = vmov 0.0  }
  0x2b   : > { %vm546_vm2 = vcmp.lt.s32.totalorder %v543_v19, 16  ;;  %413 = vst.msk [vmem:[#allocation2] sm:$0xff] %vm412_vm3, %v1217_v24  ;;  %v1024_v27 = vld [vmem:[%s1342_s12 + $0x38] sm:$0xff]  ;;  %v1023_v28 = vld [vmem:[%s1342_s12 + $0x30] sm:$0xff]  ;;  %v1022_v29 = vld [vmem:[%s1342_s12 + $0x28] sm:$0xff]  ;;  %vm703_vm4 = vcmask 1043456  }
  0x2c   : > { %414 = vst.msk [vmem:[#allocation2 + $0x8] sm:$0xff] %vm412_vm3, %v1217_v24  ;;  %655 = vmatpush.bf16.msra.mxu1 %v1024_v27  ;;  %v1021_v42 = vld [vmem:[%s1342_s12 + $0x20] sm:$0xff]  ;;  %v1020_v43 = vld [vmem:[%s1342_s12 + $0x18] sm:$0xff]  ;;  %v1019_v44 = vld [vmem:[%s1342_s12 + $0x10] sm:$0xff]  ;;  %p726_p1 = scmp.eq.s32.totalorder %s1198_s21, 3  ;;  %vm723_vm5 = vcmask 261120  }
  0x2d   : > { %418 = vst.msk [vmem:[#allocation4] sm:$0xff] %vm417_vm1, %v1219_v26  ;;  %v1018_v45 = vld [vmem:[%s1342_s12 + $0x8] sm:$0xff]  ;;  %v1017_v46 = vld [vmem:[%s1342_s12] sm:$0xff] }
  0x2e   : > { %415 = vst.msk [vmem:[#allocation3] sm:$0xff] %vm412_vm3, %v1219_v26 }
  0x2f   : > { %416 = vst.msk [vmem:[#allocation3 + $0x8] sm:$0xff] %vm412_vm3, %v1219_v26 }
  0x30   : > { %419 = vst.msk [vmem:[#allocation4 + $0x8] sm:$0xff] %vm417_vm1, %v1219_v26  ;;  %656 = vmatpush.bf16.msra.mxu1 %v1023_v28  ;;  %v698_v26 = vld [vmem:[#allocation5 + $0x8] sm:$0xff] }
  0x31   : > { %528 = vmatpush.bf16.xpose.msra.mxu0 %v522_v4 }
  0x32   : > { %v549_v30 = vld [vmem:[#allocation2] sm:$0xff] }
  0x33   : > { %v550_v35 = vld [vmem:[#allocation2 + $0x8] sm:$0xff] }
  0x34   : > { %657 = vmatpush.bf16.msra.mxu1 %v1022_v29  ;;  %v592_v1 = vld [vmem:[#allocation4] sm:$0xff] }
  0x35   : > { %v579_v56 = vld [vmem:[#allocation3] sm:$0xff] }
  0x36   : > { %v580_v60 = vld [vmem:[#allocation3 + $0x8] sm:$0xff] }
  0x38   : > { %658 = vmatpush.bf16.msra.mxu1 %v1021_v42 }
  0x39   : > { %529 = vmatpush.bf16.xpose.msra.mxu0 %v519_v6 }
  0x3c   : > { %659 = vmatpush.bf16.msra.mxu1 %v1020_v43 }
  0x40   : > { %660 = vmatpush.bf16.msra.mxu1 %v1019_v44 }
  0x41   : > { %530 = vmatpush.bf16.xpose.msra.mxu0 %v516_v8  ;;  %v593_v8 = vld [vmem:[#allocation4 + $0x8] sm:$0xff] }
  0x44   : > { %661 = vmatpush.bf16.msra.mxu1 %v1018_v45 }
  0x48   : > { %662 = vmatpush.bf16.msra.mxu1 %v1017_v46 }
  0x49   : > { %531 = vmatpush.bf16.xpose.msra.mxu0 %v513_v10 }
  0x51   : > { %532 = vmatpush.bf16.xpose.msra.mxu0 %v510_v12 }
  0x59   : > { %533 = vmatpush.bf16.xpose.msra.mxu0 %v507_v14  ;;  %v699_v14 = vld [vmem:[%s1347_s16] sm:$0xf] }
  0x5a   : > { %v705_v15 = vsel %vm703_vm4, %v699_v14, 0 }
  0x5b   : > { %714 = vmatpush.bf16.msra.mxu2 %v705_v15 }
  0x61   : > { %534 = vmatpush.bf16.xpose.msra.mxu0 %v504_v16 }
  0x68   : > { %967 = vmatmul.msk.bf16.vlgmr.msra.gmra.mxu0 %vm417_vm1, %v1008_v17 }
  0xe5   : > { %v536_v20 = vpop.f32.mrf.mxu0 }
  0xe6   : > { %v547_v21 = vsel %vm546_vm2, %v536_v20, -1e+30 }
  0xe7   : > { %551 = vmax.xlane.f32.xlu0 %v547_v21 }
  0xed   : > { %v538_v22 = vpop.f32.mrf.mxu0 }
  0xee   : > { %v548_v23 = vsel %vm546_vm2, %v538_v22, -1e+30 }
  0xef   : > { %553 = vmax.xlane.f32.xlu0 %v548_v23 }
 0x15a   : > { %v552_v31 = vpop.xlane.xlu0 %551 }
 0x15b   : > { %v555_v32 = vmax.f32 %v549_v30, %v552_v31 }
 0x15d   : > { %v557_v33 = vsub.f32 %v549_v30, %v555_v32  ;;  %673 = vst.msk [vmem:[#allocation2] sm:$0xff] %vm412_vm3, %v555_v32  ;;  %565 = vperm.xlu1 %1104, %v555_v32   ;;  %v1119_v30 = vld [vmem:[%s1448_s4] ss:$0 sm:$0xff] (%p726_p1) }
 0x15f   : > { %v559_v34 = vmul.f32 1.442695, %v557_v33 }
 0x161   : > { %1107 = vpow2.f32 %v559_v34 }
 0x162   : > { %v554_v36 = vpop.xlane.xlu0 %553 }
 0x163   : > { %v556_v37 = vmax.f32 %v550_v35, %v554_v36 }
 0x165   : > { %v558_v38 = vsub.f32 %v550_v35, %v556_v37  ;;  %674 = vst.msk [vmem:[#allocation2 + $0x8] sm:$0xff] %vm412_vm3, %v556_v37  ;;  %570 = vperm.xlu1 %1104, %v556_v37  }
 0x167   : > { %v1108_v39 = vpop.eup %1107  ;;  %v561_v40 = vmul.f32 1.442695, %v558_v38 }
 0x168   : > { %596 = vperm.xlu0 %1105, %v1108_v39   ;;  %v581_v57 = vmul.f32 %v1108_v39, %v579_v56 }
 0x169   : > { %1109 = vpow2.f32 %v561_v40 }
 0x16f   : > { %v1110_v41 = vpop.eup %1109 }
 0x170   : > { %601 = vperm.xlu1 %1104, %v1110_v41   ;;  %v582_v61 = vmul.f32 %v1110_v41, %v580_v60 }
 0x1cf   : > { %v566_v47 = vpop.permute.xlu1 %565 }
 0x1d0   : > { %v573_v48 = vsub.f32 %v547_v21, %v566_v47 }
 0x1d2   : > { %v575_v49 = vmul.f32 1.442695, %v573_v48 }
 0x1d4   : > { %1111 = vpow2.f32 %v575_v49 }
 0x1d7   : > { %v571_v50 = vpop.permute.xlu1 %570 }
 0x1d8   : > { %v574_v51 = vsub.f32 %v548_v23, %v571_v50  ;;  %v697_v23 = vld [vmem:[#allocation5] sm:$0xff] }
 0x1da   : > { %v1112_v52 = vpop.eup %1111  ;;  %v577_v53 = vmul.f32 1.442695, %v574_v51  ;;  %v597_v2 = vpop.permute.xlu0 %596 }
 0x1db   : > { %583 = vadd.xlane.f32.xlu2 %v1112_v52  ;;  %v604_v5 = vmul.f32 %v597_v2, %v592_v1 }
 0x1dc   : > { %1113 = vpow2.f32 %v577_v53 }
 0x1e2   : > { %v1114_v54 = vpop.eup %1113  ;;  %v602_v9 = vpop.permute.xlu1 %601 }
 0x1e3   : > { %585 = vadd.xlane.f32.xlu2 %v1114_v54  ;;  %v606_v55 = vpack.c.bf16 %v1114_v54, %v1112_v52  ;;  %v605_v11 = vmul.f32 %v602_v9, %v593_v8 }
 0x1e5   : > { %663 = vmatmul.bf16.vlgmr.msra.gmra.mxu1 %v606_v55 }
 0x24e   : > { %v584_v58 = vpop.xlane.xlu2 %583 }
 0x24f   : > { %v587_v59 = vadd.f32 %v584_v58, %v581_v57 }
 0x251   : > { %590 = vst.msk [vmem:[#allocation3] sm:$0xff] %vm412_vm3, %v587_v59 }
 0x256   : > { %v586_v62 = vpop.xlane.xlu2 %585 }
 0x257   : > { %v588_v63 = vadd.f32 %v586_v62, %v582_v61 }
 0x258   : > { %v678_v0 = vld [vmem:[#allocation3] sm:$0xff] }
 0x259   : > { %591 = vst.msk [vmem:[#allocation3 + $0x8] sm:$0xff] %vm412_vm3, %v588_v63  ;;  %1115 = vrcp.f32 %v678_v0 }
 0x25f   : > { %v1116_v3 = vpop.eup %1115 }
 0x260   : > { %686 = vperm.xlu2 %1106, %v1116_v3   ;;  %v679_v4 = vld [vmem:[#allocation3 + $0x8] sm:$0xff] }
 0x261   : > { %1117 = vrcp.f32 %v679_v4 }
 0x262   : > { %v664_v6 = vpop.f32.mrf.mxu1 }
 0x263   : > { %v669_v7 = vadd.f32 %v664_v6, %v604_v5 }
 0x265   : > { %671 = vst.msk [vmem:[#allocation4] sm:$0xff] %vm417_vm1, %v669_v7 }
 0x267   : > { %v1118_v10 = vpop.eup %1117 }
 0x268   : > { %691 = vperm.xlu1 %1104, %v1118_v10  }
 0x26a   : > { %v666_v12 = vpop.f32.mrf.mxu1 }
 0x26b   : > { %v670_v13 = vadd.f32 %v666_v12, %v605_v11 }
 0x26c   : > { %v682_v17 = vld [vmem:[#allocation4] sm:$0xff] }
 0x26d   : > { %672 = vst.msk [vmem:[#allocation4 + $0x8] sm:$0xff] %vm417_vm1, %v670_v13 }
 0x274   : > { %v683_v18 = vld [vmem:[#allocation4 + $0x8] sm:$0xff] }
 0x2ba   : > { %v687_v16 = vpop.permute.xlu2 %686 }
 0x2bb   : > { %v694_v20 = vmul.f32 %v687_v16, %v682_v17 }
 0x2da   : > { %v692_v19 = vpop.permute.xlu1 %691 }
 0x2db   : > { %v695_v21 = vmul.f32 %v692_v19, %v683_v18 }
 0x2dd   : > { %v696_v22 = vpack.c.bf16 %v695_v21, %v694_v20 }
 0x2df   : > { %1000 = vmatmul.msk.bf16.vlgmr.msra.gmra.mxu2 %vm417_vm1, %v696_v22 }
 0x362   : > { %v716_v24 = vpop.f32.mrf.mxu2 }
 0x363   : > { %v721_v25 = vadd.f32 %v716_v24, %v697_v23 }
 0x365   : > { %724 = vst.msk [vmem:[#allocation5] sm:$0xff] %vm723_vm5, %v721_v25 }
 0x369   : > { %730 = sbr.rel (!%p726_p1) target bundleno = 888 (0x378), region = 56 }
 0x36a   : > { %v718_v27 = vpop.f32.mrf.mxu2 }
 0x36b   : > { %v722_v28 = vadd.f32 %v718_v27, %v698_v26 }
 0x36c   : > { %v731_v29 = vld [vmem:[#allocation5] sm:$0xff] (%p726_p1) }
 0x36d   : > { %725 = vst.msk [vmem:[#allocation5 + $0x8] sm:$0xff] %vm723_vm5, %v722_v28  ;;  %v737_v32 = vadd.f32 (%p726_p1), %v1119_v30, %v731_v29 }
 0x36f   : > { %740 = vst.msk [vmem:[%s1349_s17] sm:$0xff] %vm723_vm5, %v737_v32 }
 0x374   : > { %v732_v31 = vld [vmem:[#allocation5 + $0x8] sm:$0xff] }
 0x375   : > { %v738_v33 = vadd.f32 %v1119_v30, %v732_v31 }
 0x377   : > { %741 = vst.msk [vmem:[%s1349_s17 + $0x8] sm:$0xff] %vm723_vm5, %v738_v33 }
 0x378 PF: > { %s1026_s21 = sshll.u32 %s1202_s22, 4  ;;  %s757_s29 = sshll.u32 %s1349_s17, 4  ;;  %s758_s29 = int_to_ptr.vmem [resolvable:$true] %s757_s29 }
 0x379   : > { %s756_s28 = scalar_lea.hbm %s1449_s5, %s1026_s21  ;;  %s1467_s9 = sand.u32 1, %s1190_s19  }
 0x37a   : > { %s759_s6 = sshll.u32 %s756_s28, 4  ;;  %s743_s10 = scalar_lea.sflag [#allocation7], %s1467_s9  ;;  %s760_s6 = int_to_ptr.hbm [resolvable:$true] %s759_s6 }
 0x37b   : > { %s1134_s11 = sshra.s32 %s760_s6, 4  ;;  %s1140_s22 = scalar_lea.hbm %s1449_s5, 32  ;;  %s1135_s11 = int_to_ptr.hbm [resolvable:$true] %s1134_s11 }
 0x37c   : > { %s1136_s13 = scalar_lea.hbm %s1135_s11, 16  ;;  %p1141_p6 = scmp.lt.s32.totalorder %s1135_s11, %s1449_s5 }
 0x37d   : > { %p1137_p2 = scmp.ne.s32.totalorder %s1135_s11, %s1136_s13  ;;  %p1142_p7 = scmp.lt.s32.totalorder %s1140_s22, %s1136_s13 }
 0x37f   : > { %p1138_p4 = pnand %p1137_p2, %p1301_p3  ;;  %p1143_p8 = por %p1142_p7, %p1141_p6 }
 0x381   : > { %p1139_p5 = pneg %p1138_p4 }
 0x383   : > { %p1144_p10 = pnand %p1143_p8, %p1139_p5 }
 0x385   : > { %1147 = shalt.err (!%p1144_p10)
}
 0x386   : > { %s1220_s12 = smov 128   ;;  %s1221_s14 = smov 8  }
 0x387   : > { %1027 = dma.vmem_to_hbm [thread:$0]  (%p1301_p3), %s758_s29, 256, %s760_s6, %s743_s10, %s1220_s12, %s1220_s12, %s1221_s14  }
 0x388 PF: > { %s1468_s15 = sld [smem:[#allocation9_spill]]  ;;  %p1033_p11 = scmp.ge.s32.totalorder %s1214_s25, 2 }
 0x38a   : > { %p1030_p12 = pnand %p1033_p11, %p1311_p9 }
 0x38c   : > { %p1031_p13 = pneg %p1030_p12 }
 0x38e   : > { %s774_s17 = sand.u32 1, %s1468_s15  }
 0x38f   : > { %s775_s18 = scalar_lea.sflag [#allocation7], %s774_s17 }
 0x390   : > { %1181 = dma.done.wait (%p1031_p13), %s775_s18, 256  }
 0x391   : > { %1183 = vsyncadd (%p1031_p13), %s775_s18, 4294967040  ;;  %s18_s25 = sadd.s32 1, %s1214_s25   ;;  %s1470_s20 = sld [smem:[#allocation10_spill]] }
 0x392   : > { %p15_p0 = scmp.ge.s32.totalorder %s18_s25, 10   ;;  %s1471_s21 = sld [smem:[#allocation16_spill]] }
 0x393   : > { %s1472_s30 = sld [smem:[#allocation11_spill]]  ;;  %s1476_s18 = smov %s1190_s19 }
 0x394   : > { %s1473_s22 = sld [smem:[#allocation12_spill]] }
 0x395   : > { %s1474_s23 = sld [smem:[#allocation13_spill]]  ;;  %17 = sbr.rel (!%p15_p0) target bundleno = 5 (0x5), region = 100 }
 0x396   : > { %s1475_s24 = sld [smem:[#allocation14_spill]] }
 0x397   : > { %s1477_s19 = smov %s1470_s20 }
 0x398   : > { %s1478_s20 = smov %s1471_s21 }
 0x399   : > { %s1479_s21 = smov %s1472_s30 }
 0x39a   :  { %781 = vsyncpa [#allocation7], 1 }
 0x39b   :  { %783 = vsyncpa [#allocation7 + $0x1], 1 }

</bundles_post_ra>
